<compile_context>
chip_gen: v5e
topology: v5e:2x2
jax: 0.10.0
libtpu: 0.0.40
codegen_flags: <defaults>
</compile_context>

<pallas_src>
import functools

import jax
import jax.numpy as jnp
from jax.experimental import pallas as pl
from jax.experimental.pallas import tpu as pltpu

SUBLANE = 8  # f32 sublane height; bf16 packs 2 rows per sublane


def _round_up(x, m):
    return ((x + m - 1) // m) * m


def qnet_kernel(x_ref, w1_ref, b1_ref, w2_ref, b2_ref, o_ref):
    """One batch tile: out = relu(x @ W1 + b1) @ W2 + b2 (weights VMEM-resident)."""
    x = x_ref[...]                                                     # (TB, OBS)
    # First matmul on the MXU, accumulate in f32.
    h = jnp.dot(x, w1_ref[...], preferred_element_type=jnp.float32)   # (TB, HID)
    # Bias add + ReLU in f32 on the VPU.
    h = jnp.maximum(h + b1_ref[...], 0.0)
    # Second matmul; cast activations to the weight dtype (no-op for f32).
    out = jnp.dot(h.astype(w2_ref.dtype), w2_ref[...],
                  preferred_element_type=jnp.float32)                  # (TB, OUT)
    o_ref[...] = (out + b2_ref[...]).astype(o_ref.dtype)


@functools.partial(jax.jit, static_argnames=("block_b", "param_dtype"))
def qnetwork_forward(x, w1, b1, w2, b2, *, block_b=8192, param_dtype=jnp.float32):
    """x: (B, obs) f32; w1: (obs, hidden); b1: (1, hidden);
       w2: (hidden, n_out); b2: (1, n_out).  Returns (B, n_out) f32."""
    B, obs = x.shape
    hidden = w1.shape[1]
    n_out = w2.shape[1]

    itemsize = jnp.dtype(param_dtype).itemsize
    sub = SUBLANE * max(1, 4 // itemsize)   # 8 rows f32, 16 rows bf16

    # Batch tile selection (no padding of the array itself):
    #  - large batch: multi-MiB tiles to amortize per-step overhead,
    #  - moderate batch: split into >=2 tiles so v7x's second TC gets work,
    #  - tiny batch: a single full-extent tile (legal even if not a multiple of 8).
    if B > block_b:
        tb = _round_up(block_b, sub)
    elif B >= 2 * sub:
        tb = _round_up(-(-B // 2), sub)     # ~cdiv(B, 2), sublane-aligned -> >=2 tiles
    else:
        tb = B                              # full-dim block
    grid = (pl.cdiv(B, tb),)

    # Cast only (no padding).  Default f32 -> these are no-ops.
    xk = x.astype(param_dtype)
    w1k = w1.astype(param_dtype)
    w2k = w2.astype(param_dtype)
    b1k = b1.astype(jnp.float32)
    b2k = b2.astype(jnp.float32)

    flops = 2 * B * (obs * hidden + hidden * n_out)
    bytes_accessed = (
        B * obs * itemsize                      # x stream (dominant)
        + obs * hidden * itemsize               # W1
        + hidden * n_out * itemsize             # W2
        + hidden * 4 + n_out * 4                # biases (f32)
        + B * n_out * 4                         # output writeback (f32)
    )

    out = pl.pallas_call(
        qnet_kernel,
        out_shape=jax.ShapeDtypeStruct((B, n_out), jnp.float32),
        grid_spec=pltpu.PrefetchScalarGridSpec(
            num_scalar_prefetch=0,
            grid=grid,
            in_specs=[
                pl.BlockSpec((tb, obs), lambda i: (i, 0)),        # x: tiled over batch
                pl.BlockSpec((obs, hidden), lambda i: (0, 0)),    # W1: VMEM-resident
                pl.BlockSpec((1, hidden), lambda i: (0, 0)),      # b1: VMEM-resident
                pl.BlockSpec((hidden, n_out), lambda i: (0, 0)),  # W2: VMEM-resident
                pl.BlockSpec((1, n_out), lambda i: (0, 0)),       # b2: VMEM-resident
            ],
            out_specs=pl.BlockSpec((tb, n_out), lambda i: (i, 0)),
        ),
        compiler_params=pltpu.CompilerParams(
            # Batch tiles are independent -> shard across TensorCores on v7x.
            dimension_semantics=("parallel",),
        ),
        cost_estimate=pl.CostEstimate(
            flops=flops, transcendentals=0, bytes_accessed=bytes_accessed),
    )(xk, w1k, b1k, w2k, b2k)

    return out


def init_params(key, obs_size, num_nodes, n_out):
    """Deterministic synthetic init (PyTorch-Linear-like uniform fan-in scaling).
    Weights are stored already transposed relative to torch's (out, in) layout."""
    k1, k2, k3, k4 = jax.random.split(key, 4)
    lim1 = 1.0 / jnp.sqrt(obs_size)
    lim2 = 1.0 / jnp.sqrt(num_nodes)
    w1 = jax.random.uniform(k1, (obs_size, num_nodes), jnp.float32, -lim1, lim1)
    b1 = jax.random.uniform(k2, (1, num_nodes), jnp.float32, -lim1, lim1)
    w2 = jax.random.uniform(k3, (num_nodes, n_out), jnp.float32, -lim2, lim2)
    b2 = jax.random.uniform(k4, (1, n_out), jnp.float32, -lim2, lim2)
    return w1, b1, w2, b2


if __name__ == "__main__":
    # Small shapes consistent with the module: QNetwork(obs_size=16, num_nodes=32, n_out=4).
    B, obs_size, num_nodes, n_out = 4, 16, 32, 4

    key = jax.random.PRNGKey(0)
    k_obs, k_params, k_big = jax.random.split(key, 3)
    ob = jax.random.normal(k_obs, (B, obs_size), jnp.float32)
    w1, b1, w2, b2 = init_params(k_params, obs_size, num_nodes, n_out)

    # Pure-JAX reference of the same forward semantics.
    def ref_fwd(xx):
        return jnp.maximum(xx @ w1 + b1, 0.0) @ w2 + b2

    # Tiny batch (single full-extent tile).
    out = qnetwork_forward(ob, w1, b1, w2, b2)
    jax.block_until_ready(out)
    assert out.shape == (B, n_out)
    assert jnp.allclose(out, ref_fwd(ob), atol=1e-5, rtol=1e-5)

    # Multi-tile + ragged final batch tile (300 rows, 128-row tiles -> grid of 3).
    ob_big = jax.random.normal(k_big, (300, obs_size), jnp.float32)
    out_big = qnetwork_forward(ob_big, w1, b1, w2, b2, block_b=128)
    jax.block_until_ready(out_big)
    assert out_big.shape == (300, n_out)
    assert jnp.allclose(out_big, ref_fwd(ob_big), atol=1e-4, rtol=1e-4)

    # Optional bf16 activation/weight path (MXU bf16, f32 bias+ReLU) — works on
    # v5e/v6e/v7x; halves the dominant x HBM stream.
    out_bf16 = qnetwork_forward(ob_big, w1, b1, w2, b2, block_b=128,
                                param_dtype=jnp.bfloat16)
    jax.block_until_ready(out_bf16)
    assert out_bf16.shape == (300, n_out)
    assert jnp.allclose(out_bf16, ref_fwd(ob_big), atol=0.1, rtol=0.1)

    # TODO(synk): init_network() (fill params with 1) and the training/optimizer
    # path are not part of the forward pass and are not translated here.
    print("KERNEL_OK")
</pallas_src>

<mosaic_0001>
module attributes {stable_mosaic.version = 11 : i64} {
  func.func @qnet_kernel(%arg0: i32, %arg1: memref<4x16xf32, #tpu.memory_space<vmem>>, %arg2: memref<16x32xf32, #tpu.memory_space<vmem>>, %arg3: memref<1x32xf32, #tpu.memory_space<vmem>>, %arg4: memref<32x4xf32, #tpu.memory_space<vmem>>, %arg5: memref<1x4xf32, #tpu.memory_space<vmem>>, %arg6: memref<4x4xf32, #tpu.memory_space<vmem>>) attributes {dimension_semantics = [#tpu.dimension_semantics<parallel>], iteration_bounds = array<i64: 1>, scalar_prefetch = 0 : i64, scratch_operands = 0 : i64, tpu.core_type = #tpu.core_type<tc>, window_params = [{transform_indices = @transform_0, window_bounds = array<i64: 4, 16>}, {pipeline_mode = #tpu.pipeline_mode<synchronous>, transform_indices = @transform_1, window_bounds = array<i64: 16, 32>}, {pipeline_mode = #tpu.pipeline_mode<synchronous>, transform_indices = @transform_2, window_bounds = array<i64: 1, 32>}, {pipeline_mode = #tpu.pipeline_mode<synchronous>, transform_indices = @transform_3, window_bounds = array<i64: 32, 4>}, {pipeline_mode = #tpu.pipeline_mode<synchronous>, transform_indices = @transform_4, window_bounds = array<i64: 1, 4>}, {transform_indices = @transform_5, window_bounds = array<i64: 4, 4>}]} {
    %c0 = arith.constant 0 : index
    %c0_0 = arith.constant 0 : index
    %0 = vector.load %arg1[%c0, %c0_0] : memref<4x16xf32, #tpu.memory_space<vmem>>, vector<4x16xf32>
    %c0_1 = arith.constant 0 : index
    %c0_2 = arith.constant 0 : index
    %1 = vector.load %arg2[%c0_1, %c0_2] : memref<16x32xf32, #tpu.memory_space<vmem>>, vector<16x32xf32>
    %cst = arith.constant dense<0.000000e+00> : vector<4x32xf32>
    %2 = tpu.matmul %0, %1, %cst {dimension_numbers = #tpu.dot_dimension_numbers<[1], [0], [0], [1], [0, 0, 1, 1], [], []>} : vector<4x16xf32>, vector<16x32xf32>, vector<4x32xf32> -> vector<4x32xf32>
    %c0_3 = arith.constant 0 : index
    %c0_4 = arith.constant 0 : index
    %3 = vector.load %arg3[%c0_3, %c0_4] : memref<1x32xf32, #tpu.memory_space<vmem>>, vector<1x32xf32>
    %4 = vector.broadcast %3 : vector<1x32xf32> to vector<4x32xf32>
    %5 = arith.addf %2, %4 : vector<4x32xf32>
    %cst_5 = arith.constant 0.000000e+00 : f32
    %6 = vector.broadcast %cst_5 : f32 to vector<4x32xf32>
    %7 = arith.maximumf %5, %6 : vector<4x32xf32>
    %c0_6 = arith.constant 0 : index
    %c0_7 = arith.constant 0 : index
    %8 = vector.load %arg4[%c0_6, %c0_7] : memref<32x4xf32, #tpu.memory_space<vmem>>, vector<32x4xf32>
    %cst_8 = arith.constant dense<0.000000e+00> : vector<4x4xf32>
    %9 = tpu.matmul %7, %8, %cst_8 {dimension_numbers = #tpu.dot_dimension_numbers<[1], [0], [0], [1], [0, 0, 1, 1], [], []>} : vector<4x32xf32>, vector<32x4xf32>, vector<4x4xf32> -> vector<4x4xf32>
    %c0_9 = arith.constant 0 : index
    %c0_10 = arith.constant 0 : index
    %10 = vector.load %arg5[%c0_9, %c0_10] : memref<1x4xf32, #tpu.memory_space<vmem>>, vector<1x4xf32>
    %11 = vector.broadcast %10 : vector<1x4xf32> to vector<4x4xf32>
    %12 = arith.addf %9, %11 : vector<4x4xf32>
    %c0_11 = arith.constant 0 : index
    %c0_12 = arith.constant 0 : index
    %13 = vector.load %arg6[%c0_11, %c0_12] : memref<4x4xf32, #tpu.memory_space<vmem>>, vector<4x4xf32>
    tpu.vector_store %arg6[%c0_11, %c0_12], %12 {strides = array<i32>} : memref<4x4xf32, #tpu.memory_space<vmem>>, vector<4x4xf32>,
    return
  }
  func.func @transform_0(%arg0: i32) -> (i32, i32) {
    %c0_i32 = arith.constant 0 : i32
    %c0_i32_0 = arith.constant 0 : i32
    return %arg0, %c0_i32 : i32, i32
  }
  func.func @transform_1(%arg0: i32) -> (i32, i32) {
    %c0_i32 = arith.constant 0 : i32
    %c0_i32_0 = arith.constant 0 : i32
    %c0_i32_1 = arith.constant 0 : i32
    return %c0_i32, %c0_i32_0 : i32, i32
  }
  func.func @transform_2(%arg0: i32) -> (i32, i32) {
    %c0_i32 = arith.constant 0 : i32
    %c0_i32_0 = arith.constant 0 : i32
    %c0_i32_1 = arith.constant 0 : i32
    return %c0_i32, %c0_i32_0 : i32, i32
  }
  func.func @transform_3(%arg0: i32) -> (i32, i32) {
    %c0_i32 = arith.constant 0 : i32
    %c0_i32_0 = arith.constant 0 : i32
    %c0_i32_1 = arith.constant 0 : i32
    return %c0_i32, %c0_i32_0 : i32, i32
  }
  func.func @transform_4(%arg0: i32) -> (i32, i32) {
    %c0_i32 = arith.constant 0 : i32
    %c0_i32_0 = arith.constant 0 : i32
    %c0_i32_1 = arith.constant 0 : i32
    return %c0_i32, %c0_i32_0 : i32, i32
  }
  func.func @transform_5(%arg0: i32) -> (i32, i32) {
    %c0_i32 = arith.constant 0 : i32
    %c0_i32_0 = arith.constant 0 : i32
    return %arg0, %c0_i32 : i32, i32
  }
}

</mosaic_0001>

<bundles_post_ra>
// kernel: qnetwork_forward.1
= control target key start
LH: loop header
LB: loop body
LE: loop exit
PB: predicated region body
PF: predicated region fallthrough
CT: control target
= control target key end

     0   :  { %vm28_vm0 = vcmask 130048   ;;  %s195_s0 = inlined_call_operand.vmem [shape: f32[4,16], index: 0, kind: input, shape index: {}]   ;;  %s196_s1 = inlined_call_operand.vmem [shape: f32[16,32], index: 1, kind: input, shape index: {}]   ;;  %s197_s2 = inlined_call_operand.vmem [shape: f32[1,32], index: 2, kind: input, shape index: {}]   ;;  %s198_s3 = inlined_call_operand.vmem [shape: f32[32,4], index: 3, kind: input, shape index: {}]   ;;  %s199_s4 = inlined_call_operand.vmem [shape: f32[1,4], index: 4, kind: input, shape index: {}]   ;;  %s200_s5 = inlined_call_operand.hbm [shape: f32[4,4], index: 5, kind: output, shape index: {}]  }
   0x1   :  { %v23_v0 = vld [vmem:[%s196_s1 + $0x8] sm:$0xff]  ;;  %v22_v1 = vld [vmem:[%s196_s1] sm:$0xff]  ;;  %v56_v3 = vld [vmem:[%s198_s3 + $0x18] sm:$0xff] }
   0x2   :  { %46 = vmatpush.msra.mxu0 %v23_v0  ;;  %v21_v2 = vld [vmem:[%s195_s0] sm:$0xf]  ;;  %77 = vmatpush.msra.mxu1 %v56_v3 }
   0x3   :  { %10 = vsyncpa [#allocation3], 0  ;;  %v55_v4 = vld [vmem:[%s198_s3 + $0x10] sm:$0xff]  ;;  %v54_v5 = vld [vmem:[%s198_s3 + $0x8] sm:$0xff]  ;;  %vm61_vm1 = vcmask 261120   ;;  %s134_s9 = smov [#allocation2]  }
   0x4   :  { %47 = vmatpush.msra.mxu0 %v22_v1  ;;  %78 = vmatpush.msra.mxu1 %v55_v4  ;;  %v53_v6 = vld [vmem:[%s198_s3] sm:$0xff]  ;;  %s92_s10 = sshll.u32 %s134_s9, 4  ;;  %s94_s3 = sshll.u32 %s200_s5, 4  ;;  %vm85_vm2 = vcmask 27648   ;;  %s93_s10 = int_to_ptr.vmem [resolvable:$true] %s92_s10  ;;  %s95_s3 = int_to_ptr.hbm [resolvable:$true] %s94_s3 }
   0x5   :  { %103 = vmatmul.msk.f32.vlgmr.msra.gmra.mxu0 %vm28_vm0, %v21_v2  ;;  %v106_v7 = vld [vmem:[%s197_s2] ss:$0 sm:$0xff] }
   0x6   :  { %79 = vmatpush.msra.mxu1 %v54_v5  ;;  %v107_v11 = vld [vmem:[%s199_s4] ss:$0 sm:$0xff] }
   0x8   :  { %80 = vmatpush.msra.mxu1 %v53_v6 }
  0x82   :  { %v49_v8 = vpop.f32.mrf.mxu0 }
  0x83   :  { %v50_v9 = vadd.f32 %v106_v7, %v49_v8 }
  0x85   :  { %v52_v10 = vmax.f32 %v50_v9, 0.0 }
  0x87   :  { %104 = vmatmul.msk.f32.vlgmr.msra.gmra.mxu1 %vm61_vm1, %v52_v10 }
 0x104   :  { %v82_v12 = vpop.f32.mrf.mxu1 }
 0x105   :  { %v83_v13 = vadd.f32 %v107_v11, %v82_v12 }
 0x107   :  { %86 = vst.msk [vmem:[#allocation2] sm:$0xf] %vm85_vm2, %v83_v13 }
 0x108   :  { %97 = dma.vmem_to_hbm [thread:$0]  %s93_s10, 64, %s95_s3, [#allocation3]  }
 0x109   :  { %132 = dma.done.wait [#allocation3], 64  }
 0x10a   :  { %133 = vsyncadd [#allocation3], 4294967232 }
 0x10b   :  { %102 = vsyncpa [#allocation3], 1 }

</bundles_post_ra>
